<compile_context>
chip_gen: v7x
topology: tpu7x:2x2x1
jax: 0.10.0
libtpu: 0.0.40
codegen_flags: <defaults>
</compile_context>

<pallas_src>
import functools

import jax
import jax.numpy as jnp
from jax.experimental import pallas as pl
from jax.experimental.pallas import tpu as pltpu


def _round_up(n, m):
    return ((n + m - 1) // m) * m


def _choose_tile_m(m_padded, insize, outsize, x_itemsize, with_dropout_bits):
    """Pick an M tile that keeps the double-buffered working set <= ~8 MiB.

    8 MiB stays well inside the default scoped-VMEM limit on every chip
    (16 MiB v5e, 32 MiB v6e, 32-of-64 MiB v7x), so no vmem_limit_bytes override
    is needed.  For much larger insize/outsize, raise this budget together with
    pltpu.CompilerParams(vmem_limit_bytes=...) and add a K grid axis.
    """
    budget = 8 * 1024 * 1024
    per_row = 2 * (insize * x_itemsize + outsize * 4)      # x + out, double-buffered
    if with_dropout_bits:
        per_row += 2 * insize * 4                           # uint32 bits, double-buffered
    tile = budget // max(per_row, 1)
    tile = max(8, min(1024, tile))                          # 512-1024 rows ~ HBM roofline
    tile = (tile // 8) * 8                                  # sublane multiple
    return min(tile, m_padded)


def _linear_kernel(x_ref, w_ref, b_ref, o_ref):
    """Eval mode: out = x @ W + b (dropout is identity)."""
    acc = jnp.dot(x_ref[...], w_ref[...], preferred_element_type=jnp.float32)
    o_ref[...] = (acc + b_ref[...].astype(jnp.float32)).astype(o_ref.dtype)


def _dropout_linear_kernel(bits_ref, x_ref, w_ref, b_ref, o_ref, *, keep_prob):
    """Training mode: inverted dropout fused with the linear.

    keep iff bits < keep_prob * 2^32 (integer-threshold compare); the
    1/keep_prob scale is applied to the (tile_m, O) accumulator, not the larger
    (tile_m, F) activation tile.
    """
    threshold = jnp.uint32(min(int(keep_prob * 4294967296.0), 4294967295))
    x = x_ref[...]
    keep = bits_ref[...] < threshold
    x = jnp.where(keep, x, jnp.zeros_like(x))
    acc = jnp.dot(x, w_ref[...], preferred_element_type=jnp.float32)
    acc = acc * jnp.float32(1.0 / keep_prob) + b_ref[...].astype(jnp.float32)
    o_ref[...] = acc.astype(o_ref.dtype)


def pos_classifier_forward(x, weight_t, bias, *, dropout_p, training, key=None):
    """x: (B, S, F); weight_t: (F, O) = PyTorch linear.weight.T; bias: (O,)."""
    B, S, F = x.shape
    O = weight_t.shape[1]
    M = B * S

    apply_dropout = bool(training) and float(dropout_p) > 0.0
    keep_prob = 1.0 - float(dropout_p)

    x2 = x.reshape(M, F)
    b2 = bias.reshape(1, O)

    # Pad M to a multiple of 8 (sublane granularity); pad rows are sliced off.
    m_padded = _round_up(M, 8)
    if m_padded != M:
        x2 = jnp.pad(x2, ((0, m_padded - M), (0, 0)))

    tile_m = _choose_tile_m(m_padded, F, O, jnp.dtype(x.dtype).itemsize,
                            apply_dropout)
    grid = (pl.cdiv(m_padded, tile_m),)

    row_spec = pl.BlockSpec((tile_m, F), lambda i: (i, 0))   # x / bits tiles
    w_spec = pl.BlockSpec((F, O), lambda i: (0, 0))          # resident weight
    b_spec = pl.BlockSpec((1, O), lambda i: (0, 0))          # resident bias
    # NOTE: O is tiny here (<128) so stores are masked; padding O to 128 would
    # cost 8x extra write bytes, so we keep it as-is (read side dominates).
    out_spec = pl.BlockSpec((tile_m, O), lambda i: (i, 0))

    compiler_params = pltpu.CompilerParams(
        dimension_semantics=("parallel",))  # shard M tiles across TCs on v7x

    if apply_dropout:
        if key is None:
            key = jax.random.PRNGKey(0)
        bits = jax.random.bits(key, (m_padded, F), dtype=jnp.uint32)
        kernel = functools.partial(_dropout_linear_kernel, keep_prob=keep_prob)
        out = pl.pallas_call(
            kernel,
            out_shape=jax.ShapeDtypeStruct((m_padded, O), x.dtype),
            grid=grid,
            in_specs=[row_spec, row_spec, w_spec, b_spec],
            out_specs=out_spec,
            compiler_params=compiler_params,
        )(bits, x2, weight_t, b2)
    else:
        out = pl.pallas_call(
            _linear_kernel,
            out_shape=jax.ShapeDtypeStruct((m_padded, O), x.dtype),
            grid=grid,
            in_specs=[row_spec, w_spec, b_spec],
            out_specs=out_spec,
            compiler_params=compiler_params,
        )(x2, weight_t, b2)

    return out[:M].reshape(B, S, O)


def init_params(key, insize, outsize):
    """PyTorch-style Linear init: U(-1/sqrt(insize), 1/sqrt(insize))."""
    kw, kb = jax.random.split(key)
    bound = 1.0 / (insize ** 0.5)
    weight_t = jax.random.uniform(kw, (insize, outsize), jnp.float32,
                                  minval=-bound, maxval=bound)
    bias = jax.random.uniform(kb, (outsize,), jnp.float32,
                              minval=-bound, maxval=bound)
    return weight_t, bias


if __name__ == "__main__":
    key = jax.random.PRNGKey(0)
    k_x, k_p, k_drop = jax.random.split(key, 3)

    batch, seq, insize, outsize = 2, 8, 32, 16
    dropout_p = 0.1

    x = jax.random.normal(k_x, (batch, seq, insize), jnp.float32)
    weight_t, bias = init_params(k_p, insize, outsize)

    # Eval mode (dropout = identity): compare against plain-JAX linear.
    out_eval = jax.block_until_ready(
        pos_classifier_forward(x, weight_t, bias, dropout_p=dropout_p,
                               training=False))
    ref_eval = jnp.einsum("bsf,fo->bso", x, weight_t) + bias
    assert out_eval.shape == (batch, seq, outsize)
    assert jnp.allclose(out_eval, ref_eval, atol=1e-3, rtol=1e-3), "eval mismatch"

    # Training mode: the wrapper draws dropout bits from `k_drop`, so the exact
    # same mask is reproducible here for a full reference check.
    out_train = jax.block_until_ready(
        pos_classifier_forward(x, weight_t, bias, dropout_p=dropout_p,
                               training=True, key=k_drop))
    M = batch * seq
    bits = jax.random.bits(k_drop, (M, insize), dtype=jnp.uint32)
    keep_prob = 1.0 - dropout_p
    threshold = jnp.uint32(int(keep_prob * 4294967296.0))
    x_dropped = jnp.where(bits < threshold, x.reshape(M, insize), 0.0)
    ref_train = ((x_dropped @ weight_t) * (1.0 / keep_prob) + bias).reshape(
        batch, seq, outsize)
    assert out_train.shape == (batch, seq, outsize)
    assert jnp.allclose(out_train, ref_train, atol=1e-3, rtol=1e-3), "train mismatch"

    print("KERNEL_OK")
</pallas_src>

<mosaic_0001>
module attributes {stable_mosaic.version = 11 : i64} {
  func.func @_linear_kernel(%arg0: i32, %arg1: memref<16x32xf32, #tpu.memory_space<vmem>>, %arg2: memref<32x16xf32, #tpu.memory_space<vmem>>, %arg3: memref<1x16xf32, #tpu.memory_space<vmem>>, %arg4: memref<16x16xf32, #tpu.memory_space<vmem>>) attributes {dimension_semantics = [#tpu.dimension_semantics<parallel>], iteration_bounds = array<i64: 1>, scalar_prefetch = 0 : i64, scratch_operands = 0 : i64, tpu.core_type = #tpu.core_type<tc>, window_params = [{transform_indices = @transform_0, window_bounds = array<i64: 16, 32>}, {pipeline_mode = #tpu.pipeline_mode<synchronous>, transform_indices = @transform_1, window_bounds = array<i64: 32, 16>}, {pipeline_mode = #tpu.pipeline_mode<synchronous>, transform_indices = @transform_2, window_bounds = array<i64: 1, 16>}, {transform_indices = @transform_3, window_bounds = array<i64: 16, 16>}]} {
    %c0 = arith.constant 0 : index
    %c0_0 = arith.constant 0 : index
    %0 = vector.load %arg1[%c0, %c0_0] : memref<16x32xf32, #tpu.memory_space<vmem>>, vector<16x32xf32>
    %c0_1 = arith.constant 0 : index
    %c0_2 = arith.constant 0 : index
    %1 = vector.load %arg2[%c0_1, %c0_2] : memref<32x16xf32, #tpu.memory_space<vmem>>, vector<32x16xf32>
    %cst = arith.constant dense<0.000000e+00> : vector<16x16xf32>
    %2 = tpu.matmul %0, %1, %cst {dimension_numbers = #tpu.dot_dimension_numbers<[1], [0], [0], [1], [0, 0, 1, 1], [], []>} : vector<16x32xf32>, vector<32x16xf32>, vector<16x16xf32> -> vector<16x16xf32>
    %c0_3 = arith.constant 0 : index
    %c0_4 = arith.constant 0 : index
    %3 = vector.load %arg3[%c0_3, %c0_4] : memref<1x16xf32, #tpu.memory_space<vmem>>, vector<1x16xf32>
    %4 = vector.broadcast %3 : vector<1x16xf32> to vector<16x16xf32>
    %5 = arith.addf %2, %4 : vector<16x16xf32>
    %c0_5 = arith.constant 0 : index
    %c0_6 = arith.constant 0 : index
    %6 = vector.load %arg4[%c0_5, %c0_6] : memref<16x16xf32, #tpu.memory_space<vmem>>, vector<16x16xf32>
    tpu.vector_store %arg4[%c0_5, %c0_6], %5 {strides = array<i32>} : memref<16x16xf32, #tpu.memory_space<vmem>>, vector<16x16xf32>,
    return
  }
  func.func @transform_0(%arg0: i32) -> (i32, i32) {
    %c0_i32 = arith.constant 0 : i32
    %c0_i32_0 = arith.constant 0 : i32
    return %arg0, %c0_i32 : i32, i32
  }
  func.func @transform_1(%arg0: i32) -> (i32, i32) {
    %c0_i32 = arith.constant 0 : i32
    %c0_i32_0 = arith.constant 0 : i32
    %c0_i32_1 = arith.constant 0 : i32
    return %c0_i32, %c0_i32_0 : i32, i32
  }
  func.func @transform_2(%arg0: i32) -> (i32, i32) {
    %c0_i32 = arith.constant 0 : i32
    %c0_i32_0 = arith.constant 0 : i32
    %c0_i32_1 = arith.constant 0 : i32
    return %c0_i32, %c0_i32_0 : i32, i32
  }
  func.func @transform_3(%arg0: i32) -> (i32, i32) {
    %c0_i32 = arith.constant 0 : i32
    %c0_i32_0 = arith.constant 0 : i32
    return %arg0, %c0_i32 : i32, i32
  }
}

</mosaic_0001>

<bundles_post_ra>
// kernel: tpu_custom_call.1
= control target key start
LH: loop header
LB: loop body
LE: loop exit
PB: predicated region body
PF: predicated region fallthrough
CT: control target
= control target key end

     0   :  { %vm28_vm0 = vcmask 261120   ;;  %s240_s0 = inlined_call_operand.vmem [shape: f32[16,32], index: 0, kind: input, shape index: {}]   ;;  %s241_s1 = inlined_call_operand.vmem [shape: f32[32,16], index: 1, kind: input, shape index: {}]   ;;  %s242_s2 = inlined_call_operand.vmem [shape: f32[1,16], index: 2, kind: input, shape index: {}]   ;;  %s243_s3 = inlined_call_operand.hbm [shape: f32[16,16], index: 3, kind: output, shape index: {}]  }
   0x1   :  { %v17_v0 = vld [vmem:[%s241_s1] sm:$0xff]  ;;  %v18_v1 = vld [vmem:[%s241_s1 + $0x8] sm:$0xff]  ;;  %v19_v2 = vld [vmem:[%s241_s1 + $0x10] sm:$0xff] }
   0x2   :  { %v149_v3 = vpack.c.bf16 %v18_v1, %v17_v0  ;;  %v20_v4 = vld [vmem:[%s241_s1 + $0x18] sm:$0xff]  ;;  %v15_v5 = vld [vmem:[%s240_s0] sm:$0xff] }
   0x3   :  { %v153_v6 = vpack.c.bf16 %v20_v4, %v19_v2  ;;  %146 = vmatprep.mubr.msk.f32.mxu0 %vm28_vm0, %v15_v5 }
   0x4   :  { %8 = vsyncpa [#allocation3], 0  ;;  %150 = vmatprep.subr.bf16.mxu0 %v149_v3  ;;  %v16_v7 = vld [vmem:[%s240_s0 + $0x8] sm:$0xff]  ;;  %v129_v8 = vld [vmem:[%s242_s2] ss:$0 sm:$0xff]  ;;  %s184_s1 = smov [#allocation2]  }
   0x5   :  { %152 = vmatpush3.bf16.msra.mxu0 %v149_v3  ;;  %s118_s26 = sshll.u32 %s184_s1, 4  ;;  %vm110_vm1 = vcmask 130048   ;;  %s119_s26 = int_to_ptr.vmem [resolvable:$true] %s118_s26 }
   0x6   :  { %154 = vmatprep.subr.bf16.mxu0 %v153_v6  ;;  %s160_s27 = scalar_lea.vmem %s119_s26, 256  ;;  %p165_p1 = scmp.lt.s32.totalorder %s119_s26, %s119_s26 }
   0x7   :  { %p161_p0 = scmp.ne.s32.totalorder %s119_s26, %s160_s27  ;;  %p166_p2 = scmp.lt.s32.totalorder %s160_s27, %s160_s27 }
   0x9   :  { %156 = vmatpush3.bf16.msra.mxu0 %v153_v6  ;;  %p167_p3 = por %p166_p2, %p165_p1 }
   0xb   :  { %p168_p4 = pnand %p167_p3, %p161_p0 }
   0xc   :  { %147 = vmatmul.mubr.msk.f32.vlgmr.msra.gmra.mrb[0].mxu0 %vm28_vm0, %v16_v7 }
  0xdf   :  { %v148_v9 = vpop.f32.mrb[0].mxu0 }
  0xe0   :  { %v107_v10 = vadd.f32 %v148_v9, %v129_v8  ;;  %v101_v11 = vpop.f32.mrb[1].mxu0 }
  0xe1   :  { %v102_v12 = vadd.f32 %v129_v8, %v101_v11 }
  0xe2   :  { %112 = vst.msk [vmem:[#allocation2 + $0x8] sm:$0xff] %vm110_vm1, %v107_v10 }
  0xe3   :  { %111 = vst.msk [vmem:[#allocation2] sm:$0xff] %vm110_vm1, %v102_v12 }
  0xe4   :  { %171 = shalt.err (!%p168_p4)
}
  0xe5   :  { %s172_s2 = scalar_lea.hbm %s243_s3, 256 }
  0xe6   :  { %p173_p5 = scmp.ne.s32.totalorder %s243_s3, %s172_s2  ;;  %p176_p6 = scmp.lt.u32.totalorder %s172_s2, %s243_s3 }
  0xe8   :  { %p178_p7 = pnand %p176_p6, %p173_p5 }
  0xea   :  { %181 = shalt.err (!%p178_p7)
}
  0xeb   :  { %s185_s6 = smov 128   ;;  %s186_s7 = smov 8  }
  0xec   :  { %124 = dma.vmem_to_hbm [thread:$0]  %s119_s26, 256, %s243_s3, [#allocation3], %s185_s6, %s185_s6, %s186_s7  }
  0xed   :  { %182 = dma.done.wait [#allocation3], 256  }
  0xee   :  { %183 = vsyncadd [#allocation3], 4294967040 }
  0xef   :  { %128 = vsyncpa [#allocation3], 1 }

</bundles_post_ra>
